<compile_context>
chip_gen: v5e
topology: v5e:2x2
jax: 0.10.0
libtpu: 0.0.40
codegen_flags: <defaults>
</compile_context>

<pallas_src>
import functools

import jax
import jax.numpy as jnp
from jax.experimental import pallas as pl
from jax.experimental.pallas import tpu as pltpu

_MiB = 1024 * 1024


# ---------------------------------------------------------------------------
# Kernel A: per-(batch, channel-tile) sufficient statistics.
# ---------------------------------------------------------------------------
def _afd_stats_kernel(s_ref, t_ref, out_ref, *, hw_total, single_k):
    s = s_ref[0].astype(jnp.float32)            # (c_tile, hw_tile)
    t = t_ref[0].astype(jnp.float32)
    hw_tile = s.shape[-1]

    if hw_total % hw_tile != 0:                 # trace-time branch: mask spatial tail
        k = pl.program_id(2)
        rem = hw_total - k * hw_tile
        col = jax.lax.broadcasted_iota(jnp.int32, s.shape, dimension=1)
        valid = col < rem
        s = jnp.where(valid, s, 0.0)            # mask BEFORE any arithmetic
        t = jnp.where(valid, t, 0.0)

    # Single fused (c_tile, 4) partial-sum update instead of 4 lane-sparse RMWs.
    partial = jnp.concatenate(
        [
            jnp.sum(s * s, axis=-1, keepdims=True),
            jnp.sum(t * t, axis=-1, keepdims=True),
            jnp.sum(s * t, axis=-1, keepdims=True),
            jnp.sum(t, axis=-1, keepdims=True),
        ],
        axis=-1,
    )                                            # (c_tile, 4)

    if single_k:
        # No spatial reduction axis: direct store, no init/accumulate needed.
        out_ref[0] = partial
    else:
        # Accumulate directly into the resident output block (P3 pattern).
        k = pl.program_id(2)

        @pl.when(k == 0)
        def _():
            out_ref[...] = jnp.zeros_like(out_ref)

        out_ref[0] += partial


# ---------------------------------------------------------------------------
# Kernel B: attention MLP + rho-weighted normalized-MSE -> scalar loss.
# ---------------------------------------------------------------------------
def _afd_epilogue_kernel(stats_ref, w1t_ref, b1_ref, w2t_ref, b2_ref, out_ref,
                         *, inv_hw, eps, batch):
    stats = stats_ref[...]                       # (B, C, 4) float32
    ss = stats[:, :, 0]
    tt = stats[:, :, 1]
    st = stats[:, :, 2]
    pooled = stats[:, :, 3] * inv_hw             # adaptive_avg_pool2d(fm_t, 1)

    # 1x1-conv attention on pooled teacher features (== two dense layers).
    h = jnp.dot(pooled, w1t_ref[...], preferred_element_type=jnp.float32) + b1_ref[...]
    h = jnp.maximum(h, 0.0)                      # ReLU, (B, mid)
    z = jnp.dot(h, w2t_ref[...], preferred_element_type=jnp.float32) + b2_ref[...]
    rho = 1.0 / (1.0 + jnp.exp(-z))              # sigmoid, (B, C)
    rho = rho / jnp.sum(rho, axis=-1, keepdims=True)

    # mean_{H,W}((s/(|s|+eps) - t/(|t|+eps))^2) from sufficient statistics.
    ns = jnp.sqrt(ss) + eps
    nt = jnp.sqrt(tt) + eps
    mse = (ss / (ns * ns) - 2.0 * st / (ns * nt) + tt / (nt * nt)) * inv_hw

    # loss = mean_b( sum_c( rho * mse ) )
    out_ref[0] = jnp.sum(rho * mse) * (1.0 / batch)


# ---------------------------------------------------------------------------
# Tiling plan / wrapper
# ---------------------------------------------------------------------------
def _tpu_vmem_capacity_bytes():
    try:
        cap = getattr(pltpu.get_tpu_info(), "vmem_capacity_bytes", None)
        if cap:
            return int(cap)
    except Exception:
        pass
    return 64 * _MiB                             # conservative (v7x per-TC physical)


def _plan_tiles(C, HW, itemsize, vmem_cap):
    """Pick (c_tile, hw_tile).

    Preferred: tile the CHANNEL axis with full spatial rows -> fully contiguous
    per-row DMA, no tail masking, and a second "parallel" grid axis (v7x two-TC
    sharding independent of B).  Fall back to spatial tiling only when even an
    8-channel slab of full rows exceeds the per-block VMEM budget.
    """
    # Per streamed element: 2 inputs x 2 pipeline buffers of the input dtype,
    # plus (mostly fused) f32 upcast/product temporaries.
    bytes_per_elem = 4 * itemsize + 8
    # ~4 MiB per f32 input block; cap total pipeline footprint per generation
    # (v7x 64 MiB physical / 32 MiB scoped default; v5e/v6e 128 MiB physical).
    budget = min(24 * _MiB, (vmem_cap * 3) // 8)
    max_elems = max(budget // bytes_per_elem, 8 * 128)

    if C * HW <= max_elems:                      # whole (C, HW) slab fits per b
        return C, HW
    if 8 * HW <= max_elems:                      # channel tiling, full spatial rows
        c_tile = min((max_elems // HW) // 8 * 8, C)
        return int(c_tile), HW
    # Spatial-reduction fallback (very large H*W): full channel rows,
    # 128-lane-aligned spatial tiles, accumulate across the k axis.
    hw_tile = min(max((max_elems // max(C, 1)) // 128 * 128, 128), HW)
    return C, int(hw_tile)


def afd_loss(fm_s, fm_t, conv1_w, conv1_b, conv2_w, conv2_b, eps=1e-6):
    """Pallas equivalent of AFD(in_channels, att_f).forward(fm_s, fm_t).

    fm_s, fm_t: [B, C, H, W] (f32 or bf16); conv weights are the 1x1-conv
    parameters of the attention block ([mid, C, 1, 1], [mid], [C, mid, 1, 1], [C]).
    Assumes B >= 2 (matching the PyTorch .squeeze() behaviour).
    """
    assert fm_s.shape == fm_t.shape, "student/teacher feature maps must match"
    B, C, H, W = fm_s.shape
    HW = H * W

    s3 = fm_s.reshape(B, C, HW)                  # native NCHW layout, no transpose
    t3 = fm_t.reshape(B, C, HW)

    itemsize = jnp.dtype(fm_s.dtype).itemsize
    vmem_cap = _tpu_vmem_capacity_bytes()
    c_tile, hw_tile = _plan_tiles(C, HW, itemsize, vmem_cap)
    n_c = pl.cdiv(C, c_tile)
    n_hw = pl.cdiv(HW, hw_tile)

    # Explicit scoped-VMEM budget: 2 inputs x 2 pipeline buffers x block
    # + f32 temporaries + the (tiny) stats output block, with 2x headroom,
    # clamped below the generation's physical VMEM.
    block_elems = c_tile * hw_tile
    vmem_needed = (4 * block_elems * itemsize    # 2 inputs x double buffer
                   + 4 * block_elems * 4         # f32 upcast/product temporaries
                   + 4 * C * 4 * 4)              # stats output blocks
    vmem_limit = int(min(max(2 * vmem_needed + 2 * _MiB, 32 * _MiB),
                         (vmem_cap * 3) // 4))

    stats = pl.pallas_call(
        functools.partial(_afd_stats_kernel, hw_total=HW, single_k=(n_hw == 1)),
        out_shape=jax.ShapeDtypeStruct((B, C, 4), jnp.float32),
        grid_spec=pltpu.PrefetchScalarGridSpec(
            num_scalar_prefetch=0,
            grid=(B, n_c, n_hw),                 # spatial reduction axis last
            in_specs=[
                pl.BlockSpec((1, c_tile, hw_tile), lambda b, j, k: (b, j, k)),
                pl.BlockSpec((1, c_tile, hw_tile), lambda b, j, k: (b, j, k)),
            ],
            out_specs=pl.BlockSpec((1, c_tile, 4), lambda b, j, k: (b, j, 0)),
        ),
        compiler_params=pltpu.CompilerParams(
            dimension_semantics=("parallel", "parallel", "arbitrary"),
            vmem_limit_bytes=vmem_limit,
        ),
    )(s3, t3)

    mid = conv1_w.shape[0]
    w1t = conv1_w.reshape(mid, C).T              # (C, mid): 1x1 conv == dense
    b1r = conv1_b.reshape(1, mid)
    w2t = conv2_w.reshape(C, mid).T              # (mid, C)
    b2r = conv2_b.reshape(1, C)

    loss = pl.pallas_call(
        functools.partial(_afd_epilogue_kernel,
                          inv_hw=1.0 / HW, eps=float(eps), batch=float(B)),
        out_shape=jax.ShapeDtypeStruct((1,), jnp.float32),
        in_specs=[pl.BlockSpec(memory_space=pltpu.VMEM)] * 5,
        out_specs=pl.BlockSpec(memory_space=pltpu.SMEM),
    )(stats, w1t, b1r, w2t, b2r)

    return loss[0]


# ---------------------------------------------------------------------------
# Plain-JAX reference (mirrors the PyTorch forward exactly).
# ---------------------------------------------------------------------------
def afd_reference(fm_s, fm_t, conv1_w, conv1_b, conv2_w, conv2_b, eps=1e-6):
    B, C, H, W = fm_s.shape
    hp = jax.lax.Precision.HIGHEST
    pooled = jnp.mean(fm_t, axis=(2, 3))                                   # (B, C)
    h = jnp.maximum(jnp.dot(pooled, conv1_w.reshape(-1, C).T, precision=hp)
                    + conv1_b, 0.0)
    z = jnp.dot(h, conv2_w.reshape(C, -1).T, precision=hp) + conv2_b
    rho = jax.nn.sigmoid(z)
    rho = rho / jnp.sum(rho, axis=1, keepdims=True)
    s_norm = jnp.sqrt(jnp.sum(fm_s * fm_s, axis=(2, 3), keepdims=True))
    t_norm = jnp.sqrt(jnp.sum(fm_t * fm_t, axis=(2, 3), keepdims=True))
    s = fm_s / (s_norm + eps)
    t = fm_t / (t_norm + eps)
    mse = jnp.mean((s - t) ** 2, axis=(2, 3))
    return jnp.mean(jnp.sum(rho * mse, axis=1))


if __name__ == "__main__":
    key = jax.random.PRNGKey(0)
    k1, k2, k3, k4, k5, k6 = jax.random.split(key, 6)

    B, C, H, W = 2, 16, 8, 8
    att_f = 0.5
    mid = int(C * att_f)

    fm_s = jax.random.normal(k1, (B, C, H, W), dtype=jnp.float32)
    fm_t = jax.random.normal(k2, (B, C, H, W), dtype=jnp.float32)

    # 1x1-conv attention parameters (kaiming-ish scale; small biases).
    conv1_w = jax.random.normal(k3, (mid, C, 1, 1), dtype=jnp.float32) * (2.0 / C) ** 0.5
    conv1_b = jax.random.normal(k4, (mid,), dtype=jnp.float32) * 0.1
    conv2_w = jax.random.normal(k5, (C, mid, 1, 1), dtype=jnp.float32) * (2.0 / mid) ** 0.5
    conv2_b = jax.random.normal(k6, (C,), dtype=jnp.float32) * 0.1

    loss = afd_loss(fm_s, fm_t, conv1_w, conv1_b, conv2_w, conv2_b)
    jax.block_until_ready(loss)

    ref = afd_reference(fm_s, fm_t, conv1_w, conv1_b, conv2_w, conv2_b)
    assert jnp.allclose(loss, ref, rtol=1e-3, atol=1e-6), (loss, ref)

    print("KERNEL_OK")
</pallas_src>

<mosaic_0001>
module attributes {stable_mosaic.version = 11 : i64} {
  func.func @_afd_stats_kernel(%arg0: i32, %arg1: i32, %arg2: i32, %arg3: memref<1x16x64xf32, #tpu.memory_space<vmem>>, %arg4: memref<1x16x64xf32, #tpu.memory_space<vmem>>, %arg5: memref<1x16x4xf32, #tpu.memory_space<vmem>>) attributes {dimension_semantics = [#tpu.dimension_semantics<parallel>, #tpu.dimension_semantics<parallel>, #tpu.dimension_semantics<arbitrary>], iteration_bounds = array<i64: 2, 1, 1>, scalar_prefetch = 0 : i64, scratch_operands = 0 : i64, tpu.core_type = #tpu.core_type<tc>, window_params = [{transform_indices = @transform_0, window_bounds = array<i64: 1, 16, 64>}, {transform_indices = @transform_1, window_bounds = array<i64: 1, 16, 64>}, {transform_indices = @transform_2, window_bounds = array<i64: 1, 16, 4>}]} {
    %c0 = arith.constant 0 : index
    %c0_0 = arith.constant 0 : index
    %c0_1 = arith.constant 0 : index
    %0 = vector.load %arg3[%c0, %c0_0, %c0_1] : memref<1x16x64xf32, #tpu.memory_space<vmem>>, vector<1x16x64xf32>
    %1 = vector.shape_cast %0 : vector<1x16x64xf32> to vector<16x64xf32>
    %c0_2 = arith.constant 0 : index
    %c0_3 = arith.constant 0 : index
    %c0_4 = arith.constant 0 : index
    %2 = vector.load %arg4[%c0_2, %c0_3, %c0_4] : memref<1x16x64xf32, #tpu.memory_space<vmem>>, vector<1x16x64xf32>
    %3 = vector.shape_cast %2 : vector<1x16x64xf32> to vector<16x64xf32>
    %4 = arith.mulf %1, %1 : vector<16x64xf32>
    %cst = arith.constant dense<0.000000e+00> : vector<16xf32>
    %5 = vector.multi_reduction <add>, %4, %cst [1] : vector<16x64xf32> to vector<16xf32>
    %6 = vector.shape_cast %5 : vector<16xf32> to vector<16x1xf32>
    %7 = arith.mulf %3, %3 : vector<16x64xf32>
    %cst_5 = arith.constant dense<0.000000e+00> : vector<16xf32>
    %8 = vector.multi_reduction <add>, %7, %cst_5 [1] : vector<16x64xf32> to vector<16xf32>
    %9 = vector.shape_cast %8 : vector<16xf32> to vector<16x1xf32>
    %10 = arith.mulf %1, %3 : vector<16x64xf32>
    %cst_6 = arith.constant dense<0.000000e+00> : vector<16xf32>
    %11 = vector.multi_reduction <add>, %10, %cst_6 [1] : vector<16x64xf32> to vector<16xf32>
    %12 = vector.shape_cast %11 : vector<16xf32> to vector<16x1xf32>
    %cst_7 = arith.constant dense<0.000000e+00> : vector<16xf32>
    %13 = vector.multi_reduction <add>, %3, %cst_7 [1] : vector<16x64xf32> to vector<16xf32>
    %14 = vector.shape_cast %13 : vector<16xf32> to vector<16x1xf32>
    %15 = tpu.concatenate %6, %9, %12, %14 in 1 : vector<16x1xf32>, vector<16x1xf32>, vector<16x1xf32>, vector<16x1xf32> -> vector<16x4xf32>
    %c0_8 = arith.constant 0 : index
    %c0_9 = arith.constant 0 : index
    %c0_10 = arith.constant 0 : index
    %16 = vector.load %arg5[%c0_8, %c0_9, %c0_10] : memref<1x16x4xf32, #tpu.memory_space<vmem>>, vector<1x16x4xf32>
    %17 = vector.shape_cast %16 : vector<1x16x4xf32> to vector<16x4xf32>
    %18 = vector.shape_cast %15 : vector<16x4xf32> to vector<1x16x4xf32>
    tpu.vector_store %arg5[%c0_8, %c0_9, %c0_10], %18 {strides = array<i32>} : memref<1x16x4xf32, #tpu.memory_space<vmem>>, vector<1x16x4xf32>,
    return
  }
  func.func @transform_0(%arg0: i32, %arg1: i32, %arg2: i32) -> (i32, i32, i32) {
    %c0_i32 = arith.constant 0 : i32
    return %arg0, %arg1, %arg2 : i32, i32, i32
  }
  func.func @transform_1(%arg0: i32, %arg1: i32, %arg2: i32) -> (i32, i32, i32) {
    %c0_i32 = arith.constant 0 : i32
    return %arg0, %arg1, %arg2 : i32, i32, i32
  }
  func.func @transform_2(%arg0: i32, %arg1: i32, %arg2: i32) -> (i32, i32, i32) {
    %c0_i32 = arith.constant 0 : i32
    %c0_i32_0 = arith.constant 0 : i32
    return %arg0, %arg1, %c0_i32 : i32, i32, i32
  }
}

</mosaic_0001>

<bundles_post_ra>
// kernel: tpu_custom_call.1
= control target key start
LH: loop header
LB: loop body
LE: loop exit
PB: predicated region body
PF: predicated region fallthrough
CT: control target
= control target key end

     0   :  { %7 = vsyncpa [#allocation3], 0  ;;  %s755_s0 = inlined_call_operand.hbm [shape: f32[2,16,64], index: 0, kind: input, shape index: {}]   ;;  %s756_s1 = inlined_call_operand.hbm [shape: f32[2,16,64], index: 1, kind: input, shape index: {}]   ;;  %s757_s2 = inlined_call_operand.vmem [shape: f32[2,16,4], index: 2, kind: output, shape index: {}]  }
   0x1   :  { %9 = vsyncpa [#allocation3 + $0x1], 0 }
   0x2   :  { %10 = vsyncpa [#allocation5], 0 }
   0x3   :  { %12 = vsyncpa [#allocation5 + $0x1], 0  ;;  %s639_s9 = smov 0   ;;  %s641_s10 = smov 0  }
   0x4   :  { %s643_s11 = smov 0   ;;  %s645_s12 = smov 0  }
   0x5   :  { %s647_s13 = smov 0   ;;  %s649_s14 = smov 0  }
   0x6 LB: > { %s424_s15 = sadd.s32 4294967295, %s620_s14   ;;  %s37_s16 = sadd.s32 1, %s616_s13  ;;  %s620_s14 = sphi %s649_s14, %s18_s14   ;;  %s616_s13 = sphi %s647_s13, %s765_s13   ;;  %s612_s12 = sphi %s645_s12, %s764_s12   ;;  %s608_s11 = sphi %s643_s11, %s763_s11   ;;  %s604_s10 = sphi %s641_s10, %s762_s10   ;;  %s600_s9 = sphi %s639_s9, %s761_s9  }
   0x7   : > { %p39_p0 = scmp.ge.s32.totalorder %s37_s16, 2  ;;  %s48_s17 = sadd.s32 1, %s608_s11 }
   0x8   : > { %p55_p1 = scmp.ne.s32.totalorder %s608_s11, %s604_s10  ;;  %p56_p2 = scmp.eq.s32.totalorder %s620_s14, 0 }
   0x9   : > { %s767_s16 = smov (%p39_p0, %s37_s16), 0  ;;  %p61_p4 = scmp.ne.s32.totalorder %s604_s10, %s600_s9 }
   0xa   : > { %p675_p3 = por %p56_p2, %p55_p1  ;;  %s41_s19 = ssub.s32 %s616_s13, %s767_s16 }
   0xb   : > { %p62_p5 = scmp.eq.s32.totalorder %s424_s15, 0  ;;  %p46_p6 = scmp.eq.s32.totalorder %s41_s19, 0 }
   0xc   : > { %p455_p8 = scmp.lt.s32.totalorder %s620_s14, 2  ;;  %s691_s22 = sand.u32 1, %s608_s11  }
   0xd   : > { %p682_p7 = por %p62_p5, %p61_p4  ;;  %s441_s23 = sshll.u32 %s616_s13, 4 }
   0xe   : > { %s688_s21 = scalar_select %p46_p6, %s608_s11, %s48_s17  }
   0xf   : > { %s428_s24 = sshll.u32 %s691_s22, 4  ;;  %s155_s27 = scalar_lea.hbm %s755_s0, %s441_s23 }
  0x10   : > { %s156_s28 = sshll.u32 %s155_s27, 4  ;;  %s147_s29 = scalar_lea.vmem [#allocation2], %s428_s24  ;;  %s157_s28 = int_to_ptr.hbm [resolvable:$true] %s156_s28 }
  0x11   : > { %s158_s30 = sshll.u32 %s147_s29, 4  ;;  %p700_p9 = pnand %p455_p8, %p675_p3  ;;  %s159_s30 = int_to_ptr.vmem [resolvable:$true] %s158_s30 }
  0x12   : > { %p434_p10 = scmp.ge.s32.totalorder %s620_s14, 1  ;;  %p191_p11 = scmp.lt.s32.totalorder %s620_s14, 3 }
  0x13   : > { %s144_s4 = scalar_lea.sflag [#allocation3], %s691_s22  ;;  %s622_s5 = smov 128  }
  0x14   : > { %s623_s6 = smov 8   ;;  %p192_p12 = pnand %p434_p10, %p191_p11 }
  0x15   : > { %451 = dma.hbm_to_vmem [thread:$0]  (!%p700_p9), %s157_s28, 256, %s159_s30, %s144_s4, %s622_s5, %s622_s5, %s623_s6  }
  0x16   : > { %s180_s9 = scalar_lea.hbm %s756_s1, %s441_s23  ;;  %s172_s17 = scalar_lea.vmem [#allocation4], %s428_s24 }
  0x17   : > { %s181_s15 = sshll.u32 %s180_s9, 4  ;;  %s183_s18 = sshll.u32 %s172_s17, 4  ;;  %s182_s15 = int_to_ptr.hbm [resolvable:$true] %s181_s15  ;;  %s184_s18 = int_to_ptr.vmem [resolvable:$true] %s183_s18 }
  0x18   : > { %s169_s19 = scalar_lea.sflag [#allocation5], %s691_s22  ;;  %195 = sbr.rel (%p192_p12) target bundleno = 171 (0xab), region = 28 }
  0x19   : > { %454 = dma.hbm_to_vmem [thread:$0]  (!%p700_p9), %s182_s15, 256, %s184_s18, %s169_s19, %s622_s5, %s622_s5, %s623_s6  }
  0x1a   : > { %s197_s25 = sand.u32 (!%p192_p12), 1, %s604_s10  }
  0x1b   : > { %s435_s26 = sshll.u32 (!%p192_p12), %s197_s25, 4  ;;  %s198_s27 = scalar_lea.sflag (!%p192_p12), [#allocation3], %s197_s25 }
  0x1c   : > { %s201_s28 = scalar_lea.vmem (!%p192_p12), [#allocation2], %s435_s26 }
  0x1d   : > { %591 = dma.done.wait (%p682_p7), %s198_s27, 256  }
  0x1e   : > { %593 = vsyncadd (%p682_p7), %s198_s27, 4294967040  ;;  %s208_s23 = scalar_lea.sflag [#allocation5], %s197_s25  ;;  %s211_s24 = scalar_lea.vmem [#allocation4], %s435_s26 }
  0x1f   : > { %595 = dma.done.wait (%p682_p7), %s208_s23, 256  }
  0x20   : > { %597 = vsyncadd (%p682_p7), %s208_s23, 4294967040  ;;  %v256_v0 = vld [vmem:[%s211_s24] sm:$0xff]  ;;  %vm260_vm0 = vcmask 523264   ;;  %v257_v5 = vld [vmem:[%s211_s24 + $0x8] sm:$0xff]  ;;  %p245_p13 = scmp.lt.s32.totalorder %s612_s12, 1  ;;  %vm289_vm1 = vcmask 7168  }
  0x21   : > { %v254_v1 = vld [vmem:[%s201_s28] sm:$0xff]  ;;  %v267_v2 = vmul.f32 %v256_v0, %v256_v0  ;;  %v255_v6 = vld [vmem:[%s201_s28 + $0x8] sm:$0xff]  ;;  %v268_v10 = vmul.f32 %v257_v5, %v257_v5  ;;  %v286_v16 = vsel %vm260_vm0, %v257_v5, 0.0  ;;  %v283_v17 = vsel %vm260_vm0, %v256_v0, 0.0 }
  0x22   : > { %v258_v3 = vmul.f32 %v254_v1, %v254_v1  ;;  %v275_v4 = vmul.f32 %v256_v0, %v254_v1  ;;  %v259_v11 = vmul.f32 %v255_v6, %v255_v6  ;;  %v276_v12 = vmul.f32 %v257_v5, %v255_v6  ;;  %s769_s12 = smov (!%p245_p13, %s612_s12), 1 }
  0x23   : > { %v269_v7 = vsel %vm260_vm0, %v267_v2, 0.0  ;;  %v272_v13 = vsel %vm260_vm0, %v268_v10, 0.0  ;;  %s443_s20 = sshll.u32 %s769_s12, 4  ;;  %vm292_vm2 = vcmask 15360   ;;  %vm295_vm3 = vcmask 23552  }
  0x24   : > { %v261_v8 = vsel %vm260_vm0, %v258_v3, 0.0  ;;  %v277_v9 = vsel %vm260_vm0, %v275_v4, 0.0  ;;  %270 = vadd.xlane.f32.xlu1 %v269_v7  ;;  %v264_v14 = vsel %vm260_vm0, %v259_v11, 0.0  ;;  %v280_v15 = vsel %vm260_vm0, %v276_v12, 0.0  ;;  %s252_s30 = scalar_lea.vmem %s757_s2, %s443_s20 }
  0x25   : > { %262 = vadd.xlane.f32.xlu0 %v261_v8  ;;  %278 = vadd.xlane.f32.xlu2 %v277_v9  ;;  %vm298_vm4 = vcmask 31744  }
  0x2c   : > { %273 = vadd.xlane.f32.xlu1 %v272_v13 }
  0x2d   : > { %265 = vadd.xlane.f32.xlu0 %v264_v14  ;;  %281 = vadd.xlane.f32.xlu2 %v280_v15 }
  0x34   : > { %287 = vadd.xlane.f32.xlu1 %v286_v16 }
  0x35   : > { %284 = vadd.xlane.f32.xlu0 %v283_v17 }
  0x97   : > { %v271_v18 = vpop.xlane.xlu1 %270 }
  0x98   : > { %v263_v19 = vpop.xlane.xlu0 %262  ;;  %v279_v20 = vpop.xlane.xlu2 %278 }
  0x99   : > { %v290_v23 = vsel %vm289_vm1, %v263_v19, %v271_v18 }
  0x9a   : > { %v293_v26 = vsel %vm292_vm2, %v290_v23, %v279_v20 }
  0x9f   : > { %v274_v21 = vpop.xlane.xlu1 %273 }
  0xa0   : > { %v266_v22 = vpop.xlane.xlu0 %265  ;;  %v282_v25 = vpop.xlane.xlu2 %281 }
  0xa1   : > { %v291_v24 = vsel %vm289_vm1, %v266_v22, %v274_v21 }
  0xa2   : > { %v294_v27 = vsel %vm292_vm2, %v291_v24, %v282_v25 }
  0xa7   : > { %v288_v28 = vpop.xlane.xlu1 %287 }
  0xa8   : > { %v285_v29 = vpop.xlane.xlu0 %284  ;;  %v297_v30 = vsel %vm295_vm3, %v294_v27, %v288_v28 }
  0xa9   : > { %v296_v31 = vsel %vm295_vm3, %v293_v26, %v285_v29  ;;  %300 = vst.msk [vmem:[%s252_s30 + $0x8] sm:$0xff] %vm298_vm4, %v297_v30 }
  0xaa   : > { %299 = vst.msk [vmem:[%s252_s30] sm:$0xff] %vm298_vm4, %v296_v31 }
  0xab PF: > { %s18_s14 = sadd.s32 1, %s620_s14   ;;  %s761_s9 = smov %s604_s10 }
  0xac   : > { %p15_p0 = scmp.ge.s32.totalorder %s18_s14, 4   ;;  %s762_s10 = smov %s608_s11 }
  0xad   : > { %s763_s11 = smov %s688_s21  ;;  %s764_s12 = smov %s616_s13 }
  0xae   : > { %s765_s13 = smov %s767_s16  ;;  %17 = sbr.rel (!%p15_p0) target bundleno = 6 (0x6), region = 81 }
  0xb3   :  { %331 = vsyncpa [#allocation3], 1 }
  0xb4   :  { %333 = vsyncpa [#allocation3 + $0x1], 1 }
  0xb5   :  { %334 = vsyncpa [#allocation5], 1 }
  0xb6   :  { %336 = vsyncpa [#allocation5 + $0x1], 1 }

</bundles_post_ra>
